<compile_context>
chip_gen: v6e
topology: v6e:2x2x1
jax: 0.10.0
libtpu: 0.0.40
codegen_flags: <defaults>
</compile_context>

<pallas_src>
import jax
import jax.numpy as jnp
from jax.experimental import pallas as pl
from jax.experimental.pallas import tpu as pltpu


def _round_up(x, m):
    return (x + m - 1) // m * m


# ---------------------------------------------------------------------------
# Kernel 1 (setup, one-time): radial-basis rows of the transposed TPS basis.
#   U_T[k, p] = d2 * log(d2), d2 = (gx_p - P_X[k])^2 + (gy_p - P_Y[k])^2,
#   with d2 == 0 -> U = 0 (exactly like the PyTorch module).
# ---------------------------------------------------------------------------
def _radial_basis_kernel(px_ref, py_ref, gx_ref, gy_ref, u_ref):
    dx = gx_ref[...] - px_ref[...]          # (1,T) - (NP,1) -> (NP,T)
    dy = gy_ref[...] - py_ref[...]
    d2 = dx * dx + dy * dy
    d2 = jnp.where(d2 == 0.0, 1.0, d2)      # 1 * log(1) = 0 at control points
    u_ref[...] = d2 * jnp.log(d2)


# ---------------------------------------------------------------------------
# Kernel 2: (R, K) @ (K, C) with a small resident LHS and a lane-dense,
# column-tiled RHS / output.  Used once at setup (Li fold) and once per
# forward call (the whole TPS transform).
# ---------------------------------------------------------------------------
def _small_times_wide_kernel(a_ref, b_ref, o_ref):
    o_ref[...] = jnp.dot(a_ref[...], b_ref[...],
                         preferred_element_type=jnp.float32)


def _wide_matmul(a, b, tile):
    R, K = a.shape
    K2, C = b.shape
    assert K == K2 and C % tile == 0
    return pl.pallas_call(
        _small_times_wide_kernel,
        out_shape=jax.ShapeDtypeStruct((R, C), jnp.float32),
        grid=(C // tile,),
        in_specs=[pl.BlockSpec((R, K), lambda t: (0, 0)),
                  pl.BlockSpec((K, tile), lambda t: (0, t))],
        out_specs=pl.BlockSpec((R, tile), lambda t: (0, t)),
        compiler_params=pltpu.CompilerParams(
            dimension_semantics=("parallel",)),
    )(a, b)


# ---------------------------------------------------------------------------
# Setup: equivalent of TpsGridGen.__init__ (+ the theta-independent part of
# apply_transformation hoisted out of the forward pass).
# ---------------------------------------------------------------------------
def tps_grid_gen_init(out_h=256, out_w=192, grid_size=3, tile=2048):
    N = grid_size * grid_size
    ac = jnp.linspace(-1.0, 1.0, grid_size, dtype=jnp.float32)
    # np.meshgrid(axis_coords, axis_coords): P_X varies slow, P_Y varies fast.
    P_X = jnp.repeat(ac, grid_size)
    P_Y = jnp.tile(ac, grid_size)

    # L^{-1}, exactly as TpsGridGen.compute_L_inverse.
    dx = P_X[:, None] - P_X[None, :]
    dy = P_Y[:, None] - P_Y[None, :]
    d2 = dx * dx + dy * dy
    d2 = jnp.where(d2 == 0.0, 1.0, d2)
    Kmat = d2 * jnp.log(d2)
    P = jnp.concatenate([jnp.ones((N, 1), jnp.float32),
                         P_X[:, None], P_Y[:, None]], axis=1)
    L = jnp.concatenate([
        jnp.concatenate([Kmat, P], axis=1),
        jnp.concatenate([P.T, jnp.zeros((3, 3), jnp.float32)], axis=1)], axis=0)
    # TODO(synk): torch.inverse has no Pallas equivalent; one-time setup glue.
    Li = jnp.linalg.inv(L)

    # Output sampling grid, flattened row-major (p = h*out_w + w), lane-dense.
    xs = jnp.linspace(-1.0, 1.0, out_w, dtype=jnp.float32)
    ys = jnp.linspace(-1.0, 1.0, out_h, dtype=jnp.float32)
    gx = jnp.tile(xs[None, :], (out_h, 1)).reshape(-1)   # x varies along W
    gy = jnp.tile(ys[:, None], (1, out_w)).reshape(-1)   # y varies along H
    HW = out_h * out_w
    HWp = _round_up(HW, tile)
    gxf = jnp.pad(gx, (0, HWp - HW)).reshape(1, HWp)
    gyf = jnp.pad(gy, (0, HWp - HW)).reshape(1, HWp)

    NP = _round_up(N, 8)        # padded control-point count (rows of M_T)
    KP = _round_up(N + 3, 8)    # padded basis-row count (radial + affine)

    # Radial rows of the transposed basis (Pallas kernel, tiled over pixels).
    px_col = jnp.pad(P_X, (0, NP - N)).reshape(NP, 1)
    py_col = jnp.pad(P_Y, (0, NP - N)).reshape(NP, 1)
    u_rad = pl.pallas_call(
        _radial_basis_kernel,
        out_shape=jax.ShapeDtypeStruct((NP, HWp), jnp.float32),
        grid=(HWp // tile,),
        in_specs=[pl.BlockSpec((NP, 1), lambda t: (0, 0)),
                  pl.BlockSpec((NP, 1), lambda t: (0, 0)),
                  pl.BlockSpec((1, tile), lambda t: (0, t)),
                  pl.BlockSpec((1, tile), lambda t: (0, t))],
        out_specs=pl.BlockSpec((NP, tile), lambda t: (0, t)),
        compiler_params=pltpu.CompilerParams(
            dimension_semantics=("parallel",)),
    )(px_col, py_col, gxf, gyf)

    # Augmented, transposed basis: rows = [U_0..U_{N-1}, 1, g_x, g_y, 0-pad].
    u_aug_t = jnp.concatenate(
        [u_rad[:N],
         jnp.ones((1, HWp), jnp.float32), gxf, gyf,
         jnp.zeros((KP - (N + 3), HWp), jnp.float32)], axis=0)   # (KP, HWp)

    # Fold Li into the basis:  M_T = Li[:, :N]^T @ U_aug_T   -> (NP, HWp).
    liT = jnp.zeros((NP, KP), jnp.float32).at[:N, :N + 3].set(
        jnp.transpose(Li[:, :N]))
    m_t = _wide_matmul(liT, u_aug_t, tile)

    return dict(P_X=P_X, P_Y=P_Y, m_t=m_t, N=N, NP=NP,
                out_h=out_h, out_w=out_w, HW=HW, HWp=HWp, tile=tile)


# ---------------------------------------------------------------------------
# Forward: equivalent of TpsGridGen.forward(theta) -> (B, H, W, 2) grid.
# ---------------------------------------------------------------------------
def tps_grid_gen(theta, tps):
    N, NP = tps["N"], tps["NP"]
    H, W = tps["out_h"], tps["out_w"]
    HW, tile = tps["HW"], tps["tile"]
    if theta.ndim > 2:                       # accept (B, 2N, 1, 1) like PyTorch
        theta = theta.reshape(theta.shape[0], -1)
    B = theta.shape[0]
    Q_X = theta[:, :N] + tps["P_X"][None, :]
    Q_Y = theta[:, N:] + tps["P_Y"][None, :]
    B2P = _round_up(2 * B, 8)
    q_all = jnp.zeros((B2P, NP), jnp.float32)
    q_all = q_all.at[:B, :N].set(Q_X).at[B:2 * B, :N].set(Q_Y)

    # One lane-dense MXU matmul per forward: (2B_pad, NP) @ (NP, HW_pad).
    out = _wide_matmul(q_all, tps["m_t"], tile)
    xp = out[:B, :HW].reshape(B, H, W)
    yp = out[B:2 * B, :HW].reshape(B, H, W)
    return jnp.stack([xp, yp], axis=-1)      # [..., 0] = x', [..., 1] = y'


# ---------------------------------------------------------------------------
# Pure-JAX reference that mirrors the PyTorch math term-by-term (element-wise
# contractions, independent of the MXU path) for correctness checking.
# ---------------------------------------------------------------------------
def tps_reference(theta, out_h, out_w, grid_size):
    N = grid_size * grid_size
    ac = jnp.linspace(-1.0, 1.0, grid_size, dtype=jnp.float32)
    P_X = jnp.repeat(ac, grid_size)
    P_Y = jnp.tile(ac, grid_size)
    dxm = P_X[:, None] - P_X[None, :]
    dym = P_Y[:, None] - P_Y[None, :]
    d2m = dxm * dxm + dym * dym
    d2m = jnp.where(d2m == 0.0, 1.0, d2m)
    Kmat = d2m * jnp.log(d2m)
    P = jnp.concatenate([jnp.ones((N, 1), jnp.float32),
                         P_X[:, None], P_Y[:, None]], axis=1)
    L = jnp.concatenate([
        jnp.concatenate([Kmat, P], axis=1),
        jnp.concatenate([P.T, jnp.zeros((3, 3), jnp.float32)], axis=1)], axis=0)
    Li = jnp.linalg.inv(L)
    xs = jnp.linspace(-1.0, 1.0, out_w, dtype=jnp.float32)
    ys = jnp.linspace(-1.0, 1.0, out_h, dtype=jnp.float32)
    gx = jnp.tile(xs[None, :], (out_h, 1))
    gy = jnp.tile(ys[:, None], (1, out_w))

    Q_X = theta[:, :N] + P_X[None, :]
    Q_Y = theta[:, N:] + P_Y[None, :]
    W_X = jnp.sum(Li[:N, :N][None] * Q_X[:, None, :], axis=-1)
    W_Y = jnp.sum(Li[:N, :N][None] * Q_Y[:, None, :], axis=-1)
    A_X = jnp.sum(Li[N:, :N][None] * Q_X[:, None, :], axis=-1)
    A_Y = jnp.sum(Li[N:, :N][None] * Q_Y[:, None, :], axis=-1)

    d2 = (gx[..., None] - P_X) ** 2 + (gy[..., None] - P_Y) ** 2   # (H, W, N)
    d2 = jnp.where(d2 == 0.0, 1.0, d2)
    U = d2 * jnp.log(d2)
    Xp = (A_X[:, 0][:, None, None] + A_X[:, 1][:, None, None] * gx
          + A_X[:, 2][:, None, None] * gy
          + jnp.sum(W_X[:, None, None, :] * U[None], axis=-1))
    Yp = (A_Y[:, 0][:, None, None] + A_Y[:, 1][:, None, None] * gx
          + A_Y[:, 2][:, None, None] * gy
          + jnp.sum(W_Y[:, None, None, :] * U[None], axis=-1))
    return jnp.stack([Xp, Yp], axis=-1)


if __name__ == "__main__":
    key = jax.random.PRNGKey(0)
    configs = [
        dict(batch=2, out_h=64, out_w=48, grid_size=3),   # module default gs=3
        dict(batch=2, out_h=64, out_w=48, grid_size=5),   # CP-VTON GMM uses gs=5
    ]
    for cfg in configs:
        B, H, W, gs = cfg["batch"], cfg["out_h"], cfg["out_w"], cfg["grid_size"]
        N = gs * gs
        key, sub = jax.random.split(key)
        theta = 0.1 * jax.random.normal(sub, (B, 2 * N), dtype=jnp.float32)

        tps = tps_grid_gen_init(out_h=H, out_w=W, grid_size=gs, tile=2048)
        grid = tps_grid_gen(theta, tps)
        jax.block_until_ready(grid)

        assert grid.shape == (B, H, W, 2), grid.shape
        assert bool(jnp.all(jnp.isfinite(grid)))

        ref = tps_reference(theta, H, W, gs)
        err = float(jnp.max(jnp.abs(grid - ref)))
        # Typical error is ~1e-6 (f32 MXU path); loose bound only guards
        # against multi-pass rounding differences, not structural errors.
        assert err < 2e-2, f"max |pallas - reference| = {err}"
    print("KERNEL_OK")
</pallas_src>

<mosaic_0001>
module attributes {stable_mosaic.version = 11 : i64} {
  func.func @_radial_basis_kernel(%arg0: i32, %arg1: memref<16x1xf32, #tpu.memory_space<vmem>>, %arg2: memref<16x1xf32, #tpu.memory_space<vmem>>, %arg3: memref<1x2048xf32, #tpu.memory_space<vmem>>, %arg4: memref<1x2048xf32, #tpu.memory_space<vmem>>, %arg5: memref<16x2048xf32, #tpu.memory_space<vmem>>) attributes {dimension_semantics = [#tpu.dimension_semantics<parallel>], iteration_bounds = array<i64: 2>, scalar_prefetch = 0 : i64, scratch_operands = 0 : i64, tpu.core_type = #tpu.core_type<tc>, window_params = [{pipeline_mode = #tpu.pipeline_mode<synchronous>, transform_indices = @transform_0, window_bounds = array<i64: 16, 1>}, {pipeline_mode = #tpu.pipeline_mode<synchronous>, transform_indices = @transform_1, window_bounds = array<i64: 16, 1>}, {transform_indices = @transform_2, window_bounds = array<i64: 1, 2048>}, {transform_indices = @transform_3, window_bounds = array<i64: 1, 2048>}, {transform_indices = @transform_4, window_bounds = array<i64: 16, 2048>}]} {
    %c0 = arith.constant 0 : index
    %c0_0 = arith.constant 0 : index
    %0 = vector.load %arg3[%c0, %c0_0] : memref<1x2048xf32, #tpu.memory_space<vmem>>, vector<1x2048xf32>
    %c0_1 = arith.constant 0 : index
    %c0_2 = arith.constant 0 : index
    %1 = vector.load %arg1[%c0_1, %c0_2] : memref<16x1xf32, #tpu.memory_space<vmem>>, vector<16x1xf32>
    %2 = vector.broadcast %0 : vector<1x2048xf32> to vector<16x2048xf32>
    %3 = vector.broadcast %1 : vector<16x1xf32> to vector<16x2048xf32>
    %4 = arith.subf %2, %3 : vector<16x2048xf32>
    %c0_3 = arith.constant 0 : index
    %c0_4 = arith.constant 0 : index
    %5 = vector.load %arg4[%c0_3, %c0_4] : memref<1x2048xf32, #tpu.memory_space<vmem>>, vector<1x2048xf32>
    %c0_5 = arith.constant 0 : index
    %c0_6 = arith.constant 0 : index
    %6 = vector.load %arg2[%c0_5, %c0_6] : memref<16x1xf32, #tpu.memory_space<vmem>>, vector<16x1xf32>
    %7 = vector.broadcast %5 : vector<1x2048xf32> to vector<16x2048xf32>
    %8 = vector.broadcast %6 : vector<16x1xf32> to vector<16x2048xf32>
    %9 = arith.subf %7, %8 : vector<16x2048xf32>
    %10 = arith.mulf %4, %4 : vector<16x2048xf32>
    %11 = arith.mulf %9, %9 : vector<16x2048xf32>
    %12 = arith.addf %10, %11 : vector<16x2048xf32>
    %cst = arith.constant 0.000000e+00 : f32
    %13 = vector.broadcast %cst : f32 to vector<16x2048xf32>
    %14 = arith.cmpf oeq, %12, %13 : vector<16x2048xf32>
    %cst_7 = arith.constant 1.000000e+00 : f32
    %15 = vector.broadcast %cst_7 : f32 to vector<16x2048xf32>
    %16 = arith.select %14, %15, %12 : vector<16x2048xi1>, vector<16x2048xf32>
    %17 = math.log %16 : vector<16x2048xf32>
    %18 = arith.mulf %16, %17 : vector<16x2048xf32>
    %c0_8 = arith.constant 0 : index
    %c0_9 = arith.constant 0 : index
    %19 = vector.load %arg5[%c0_8, %c0_9] : memref<16x2048xf32, #tpu.memory_space<vmem>>, vector<16x2048xf32>
    tpu.vector_store %arg5[%c0_8, %c0_9], %18 {strides = array<i32>} : memref<16x2048xf32, #tpu.memory_space<vmem>>, vector<16x2048xf32>,
    return
  }
  func.func @transform_0(%arg0: i32) -> (i32, i32) {
    %c0_i32 = arith.constant 0 : i32
    %c0_i32_0 = arith.constant 0 : i32
    %c0_i32_1 = arith.constant 0 : i32
    return %c0_i32, %c0_i32_0 : i32, i32
  }
  func.func @transform_1(%arg0: i32) -> (i32, i32) {
    %c0_i32 = arith.constant 0 : i32
    %c0_i32_0 = arith.constant 0 : i32
    %c0_i32_1 = arith.constant 0 : i32
    return %c0_i32, %c0_i32_0 : i32, i32
  }
  func.func @transform_2(%arg0: i32) -> (i32, i32) {
    %c0_i32 = arith.constant 0 : i32
    %c0_i32_0 = arith.constant 0 : i32
    return %c0_i32, %arg0 : i32, i32
  }
  func.func @transform_3(%arg0: i32) -> (i32, i32) {
    %c0_i32 = arith.constant 0 : i32
    %c0_i32_0 = arith.constant 0 : i32
    return %c0_i32, %arg0 : i32, i32
  }
  func.func @transform_4(%arg0: i32) -> (i32, i32) {
    %c0_i32 = arith.constant 0 : i32
    %c0_i32_0 = arith.constant 0 : i32
    return %c0_i32, %arg0 : i32, i32
  }
}

</mosaic_0001>

<bundles_post_ra>
// kernel: tpu_custom_call.1
= control target key start
LH: loop header
LB: loop body
LE: loop exit
PB: predicated region body
PF: predicated region fallthrough
CT: control target
= control target key end

     0   :  { %9 = vsyncpa [#allocation3], 0  ;;  %s1748_s0 = inlined_call_operand.vmem [shape: f32[16,1], index: 0, kind: input, shape index: {}]   ;;  %s1749_s1 = inlined_call_operand.vmem [shape: f32[16,1], index: 1, kind: input, shape index: {}]   ;;  %s1750_s2 = inlined_call_operand.vmem [shape: f32[1,4096], index: 2, kind: input, shape index: {}]   ;;  %s1751_s3 = inlined_call_operand.hbm [shape: f32[1,4096], index: 3, kind: input, shape index: {}]   ;;  %s1752_s4 = inlined_call_operand.hbm [shape: f32[16,4096], index: 4, kind: output, shape index: {}]  }
   0x1   :  { %11 = vsyncpa [#allocation3 + $0x1], 0 }
   0x2   :  { %12 = vsyncpa [#allocation4], 0 }
   0x3   :  { %14 = vsyncpa [#allocation4 + $0x1], 0  ;;  %s1133_s15 = smov 0   ;;  %s1135_s16 = smov 0  }
   0x4   :  { %s1137_s17 = smov 0   ;;  %s1139_s18 = smov 0  }
   0x5 LB: > { %s1154_s19 = sadd.s32 4294967295, %s1100_s18   ;;  %s875_s20 = sadd.s32 4294967294, %s1100_s18   ;;  %s1100_s18 = sphi %s1139_s18, %s1823_s18   ;;  %s1096_s17 = sphi %s1137_s17, %s1822_s17   ;;  %s1092_s16 = sphi %s1135_s16, %s1821_s16   ;;  %s1088_s15 = sphi %s1133_s15, %s1820_s15  }
   0x6   : > { %s1158_s21 = sadd.s32 1, %s1100_s18   ;;  %s95_s22 = sadd.s32 1, %s1096_s17 }
   0x7   : > { %s92_s23 = ssub.s32 %s1100_s18, %s1158_s21  ;;  %p102_p0 = scmp.ne.s32.totalorder %s1096_s17, %s1092_s16 }
   0x8   : > { %p93_p1 = scmp.eq.s32.totalorder %s92_s23, 0  ;;  %p103_p2 = scmp.eq.s32.totalorder %s1100_s18, 0 }
   0x9   : > { %p108_p3 = scmp.ne.s32.totalorder %s1092_s16, %s1088_s15  ;;  %p109_p4 = scmp.eq.s32.totalorder %s1154_s19, 0 }
   0xa   : > { %s1170_s24 = scalar_select %p93_p1, %s1096_s17, %s95_s22  }
   0xb   : > { %p1172_p5 = por %p103_p2, %p102_p0  ;;  %p1176_p6 = por %p109_p4, %p108_p3 }
   0xc   : > { %p132_p7 = scmp.eq.s32.totalorder %s1154_s19, 1  ;;  %p138_p8 = scmp.eq.s32.totalorder %s875_s20, 1 }
   0xd   : > { %s1760_s26 = scalar_select %p1176_p6, 1, 0 }
   0xe   : > { %p904_p10 = scmp.lt.s32.totalorder %s1100_s18, 2  ;;  %p1183_p11 = por %p132_p7, %p102_p0 }
   0xf   : > { %p1187_p12 = por %p138_p8, %p108_p3  ;;  %s172_s29 = sand.u32 1, %s1096_s17  }
  0x10   : > { %s1761_s27 = scalar_select %p1183_p11, 1, 0 }
  0x11   : > { %s1762_s28 = scalar_select %p1187_p12, 1, 0 }
  0x12   : > { %s890_s30 = sshll.u32 %s1100_s18, 8  ;;  %s878_s5 = sshll.u32 %s172_s29, 4 }
  0x13   : > { %s1196_s8 = scalar_lea.hbm %s1751_s3, %s890_s30  ;;  %s176_s9 = scalar_lea.vmem [#allocation2], %s878_s5 }
  0x14   : > { %s184_s10 = sshll.u32 %s176_s9, 4  ;;  %p1200_p13 = pnand %p904_p10, %p1172_p5  ;;  %s1204_s10 = int_to_ptr.vmem [resolvable:$true] %s184_s10 }
  0x15   : > { %s173_s12 = scalar_lea.sflag [#allocation3], %s172_s29  ;;  %s1008_s13 = scalar_lea.hbm %s1196_s8, 256 }
  0x16   : > { %p1009_p2 = scmp.ne.s32.totalorder %s1196_s8, %s1008_s13  ;;  %p1010_p3 = pneg %p1200_p13 }
  0x17   : > { %s1013_s22 = scalar_lea.hbm %s1751_s3, 512  ;;  %p1014_p5 = scmp.lt.s32.totalorder %s1196_s8, %s1751_s3 }
  0x18   : > { %p1011_p4 = pnand %p1010_p3, %p1009_p2  ;;  %p1015_p8 = scmp.lt.s32.totalorder %s1013_s22, %s1008_s13 }
  0x1a   : > { %p1012_p7 = pneg %p1011_p4  ;;  %p1016_p10 = por %p1015_p8, %p1014_p5 }
  0x1c   : > { %p1017_p9 = pnand %p1016_p10, %p1012_p7 }
  0x1e   : > { %1020 = shalt.err (!%p1017_p9)
}
  0x1f   : > { %s1021_s29 = scalar_lea.vmem %s1204_s10, 256  ;;  %s1102_s30 = smov [#allocation2]  }
  0x20   : > { %p1022_p0 = scmp.ne.s32.totalorder %s1204_s10, %s1021_s29  ;;  %s1026_s5 = sshll.u32 %s1102_s30, 4  ;;  %s1027_s5 = int_to_ptr.vmem [resolvable:$false] %s1026_s5 }
  0x21   : > { %s1028_s6 = scalar_lea.vmem %s1027_s5, 512  ;;  %p1029_p4 = scmp.lt.s32.totalorder %s1204_s10, %s1027_s5 }
  0x22   : > { %p1024_p1 = pnand %p1022_p0, %p1010_p3  ;;  %p1030_p12 = scmp.lt.s32.totalorder %s1028_s6, %s1021_s29 }
  0x24   : > { %p1025_p2 = pneg %p1024_p1  ;;  %p1031_p11 = por %p1030_p12, %p1029_p4 }
  0x26   : > { %p1032_p6 = pnand %p1031_p11, %p1025_p2 }
  0x28   : > { %1035 = shalt.err (!%p1032_p6)
}
  0x29   : > { %899 = dma.hbm_to_vmem [thread:$0]  (!%p1200_p13), %s1196_s8, 256, %s1204_s10, %s173_s12  }
  0x2a   : > { %p1764_p9 = scmp.lt.s32.totalorder %s1100_s18, 3  ;;  %p1765_p7 = scmp.ge.s32.totalorder %s1100_s18, 1 }
  0x2c   : > { %p190_p0 = pnand %p1765_p7, %p1764_p9 }
  0x2e   : > { %193 = sbr.rel (%p190_p0) target bundleno = 289 (0x121), region = 36 }
  0x33   : > { %s1231_s7 = sand.u32 1, %s1092_s16   ;;  %p1766_p6 = scmp.ne.s32.totalorder %s1760_s26, 0 }
  0x34   : > { %s882_s9 = sshll.u32 %s1231_s7, 4  ;;  %s196_s13 = scalar_lea.sflag [#allocation3], %s1231_s7 }
  0x35   : > { %s1235_s14 = scalar_lea.vmem [#allocation2], %s882_s9 }
  0x36   : > { %1079 = dma.done.wait (%p1766_p6), %s196_s13, 256  }
  0x37   : > { %1081 = vsyncadd (%p1766_p6), %s196_s13, 4294967040  ;;  %v1103_v0 = vmov 0   ;;  %v365_v1 = vld [vmem:[%s1749_s1] sm:$0xff]  ;;  %v366_v3 = vld [vmem:[%s1749_s1 + $0x8] sm:$0xff]  ;;  %s884_s25 = sshll.u32 %s1154_s19, 4  ;;  %v241_v5 = vlaneseq  ;;  %s883_s6 = sshll.u32 %s1231_s7, 8 }
  0x38   : > { %943 = vset.pattern.permute.xlu1 %v1103_v0  ;;  %942 = vset.pattern.permute.xlu0 %v1103_v0  ;;  %v237_v2 = vld [vmem:[%s1748_s0] sm:$0xff]  ;;  %v238_v4 = vld [vmem:[%s1748_s0 + $0x8] sm:$0xff]  ;;  %p229_p11 = scmp.lt.s32.totalorder %s884_s25, 31  ;;  %s1572_s9 = scalar_lea.vmem [#allocation5], %s883_s6 }
  0x39   : > { %451 = vperm.xlu1 %943, %v365_v1   ;;  %323 = vperm.xlu0 %942, %v237_v2   ;;  %v242_v6 = vshrl.u32 %v241_v5, 7  ;;  %v363_v14 = vld [vmem:[%s1235_s14] sm:$0xff]  ;;  %v364_v16 = vld [vmem:[%s1235_s14 + $0x8] sm:$0xff]  ;;  %s891_s13 = sshll.u32 %s1154_s19, 11  ;;  %s793_s14 = sshll.u32 %s1572_s9, 4  ;;  %s1701_s14 = int_to_ptr.vmem [resolvable:$true] %s793_s14 }
  0x3a   : > { %s1825_s25 = smov (!%p229_p11, %s884_s25), 31  ;;  %s1697_s10 = scalar_lea.hbm %s1752_s4, %s891_s13 }
  0x3b   : > { %v243_v7 = vsub.s32 0, %v242_v6  ;;  %v247_v8 = vsub.s32 1, %v242_v6  ;;  %v251_v9 = vsub.s32 2, %v242_v6  ;;  %v255_v10 = vsub.s32 3, %v242_v6  ;;  %s231_s5 = scalar_lea.vmem %s1750_s2, %s1825_s25  ;;  %s780_s11 = scalar_lea.sflag [#allocation4], %s1231_s7 }
  0x3c   : > { %v259_v11 = vsub.s32 4, %v242_v6  ;;  %v263_v12 = vsub.s32 5, %v242_v6  ;;  %v267_v13 = vsub.s32 6, %v242_v6  ;;  %v271_v15 = vsub.s32 7, %v242_v6  ;;  %v235_v24 = vld [vmem:[%s231_s5] sm:$0xff]  ;;  %v236_v34 = vld [vmem:[%s231_s5 + $0x8] sm:$0xff] }
  0x3d   : > { %456 = vperm.xlu1 %943, %v366_v3   ;;  %328 = vperm.xlu0 %942, %v238_v4   ;;  %v372_v17 = vrot.slane %v363_v14, %v243_v7  ;;  %v376_v18 = vrot.slane %v363_v14, %v247_v8  ;;  %v380_v19 = vrot.slane %v363_v14, %v251_v9  ;;  %s1036_s12 = scalar_lea.vmem %s1701_s14, 4096  ;;  %p1817_p13 = scmp.ne.s32.totalorder %s1761_s27, 0 }
  0x3e   : > { %v384_v20 = vrot.slane %v363_v14, %v255_v10  ;;  %v388_v21 = vrot.slane %v363_v14, %v259_v11  ;;  %v392_v22 = vrot.slane %v363_v14, %v263_v12  ;;  %v396_v23 = vrot.slane %v363_v14, %v267_v13  ;;  %p1037_p12 = scmp.ne.s32.totalorder %s1701_s14, %s1036_s12  ;;  %s1104_s20 = smov [#allocation5]  }
  0x3f   : > { %v400_v25 = vrot.slane %v363_v14, %v271_v15  ;;  %v404_v26 = vrot.slane %v364_v16, %v243_v7  ;;  %v408_v27 = vrot.slane %v364_v16, %v247_v8  ;;  %v412_v28 = vrot.slane %v364_v16, %v251_v9  ;;  %s1040_s22 = sshll.u32 %s1104_s20, 4  ;;  %s1041_s22 = int_to_ptr.vmem [resolvable:$false] %s1040_s22 }
  0x40   : > { %v416_v30 = vrot.slane %v364_v16, %v255_v10  ;;  %v420_v31 = vrot.slane %v364_v16, %v259_v11  ;;  %v424_v32 = vrot.slane %v364_v16, %v263_v12  ;;  %v428_v33 = vrot.slane %v364_v16, %v267_v13  ;;  %p1038_p1 = pnand %p1037_p12, %p1817_p13  ;;  %s1042_s26 = scalar_lea.vmem %s1041_s22, 8192 }
  0x41   : > { %v432_v35 = vrot.slane %v364_v16, %v271_v15  ;;  %v1259_v36 = vrot.slane %v235_v24, %v243_v7  ;;  %v1261_v37 = vrot.slane %v235_v24, %v247_v8  ;;  %v1263_v38 = vrot.slane %v235_v24, %v251_v9  ;;  %p1043_p5 = scmp.lt.s32.totalorder %s1701_s14, %s1041_s22  ;;  %p1044_p8 = scmp.lt.s32.totalorder %s1042_s26, %s1036_s12 }
  0x42   : > { %v1265_v39 = vrot.slane %v235_v24, %v255_v10  ;;  %v1267_v40 = vrot.slane %v235_v24, %v259_v11  ;;  %v1269_v41 = vrot.slane %v235_v24, %v263_v12  ;;  %v1271_v42 = vrot.slane %v235_v24, %v267_v13  ;;  %p1039_p3 = pneg %p1038_p1 }
  0x43   : > { %v1273_v43 = vrot.slane %v235_v24, %v271_v15  ;;  %v1275_v44 = vrot.slane %v236_v34, %v243_v7  ;;  %v1277_v45 = vrot.slane %v236_v34, %v247_v8  ;;  %v1279_v46 = vrot.slane %v236_v34, %v251_v9  ;;  %p1045_p10 = por %p1044_p8, %p1043_p5 }
  0x44   : > { %v1281_v47 = vrot.slane %v236_v34, %v255_v10  ;;  %v1283_v48 = vrot.slane %v236_v34, %v259_v11  ;;  %v1285_v49 = vrot.slane %v236_v34, %v263_v12  ;;  %v1287_v50 = vrot.slane %v236_v34, %v267_v13 }
  0x45   : > { %v1289_v54 = vrot.slane %v236_v34, %v271_v15  ;;  %p1046_p2 = pnand %p1045_p10, %p1039_p3 }
  0x46   : > { %1767 = vst [vmem:[#allocation8_spill] sm:$0xff] %v1283_v48  ;;  %1768 = vst [vmem:[#allocation9_spill] sm:$0xff] %v1285_v49 }
  0x47   : > { %1769 = vst [vmem:[#allocation10_spill] sm:$0xff] %v1287_v50  ;;  %1770 = vst [vmem:[#allocation11_spill] sm:$0xff] %v1289_v54 }
  0xb4   : > { %v452_v29 = vpop.permute.xlu1 %451 }
  0xb5   : > { %v459_v51 = vsub.f32 %v372_v17, %v452_v29  ;;  %v460_v52 = vsub.f32 %v376_v18, %v452_v29  ;;  %v461_v53 = vsub.f32 %v380_v19, %v452_v29  ;;  %v462_v56 = vsub.f32 %v384_v20, %v452_v29 }
  0xb6   : > { %v463_v57 = vsub.f32 %v388_v21, %v452_v29  ;;  %v464_v58 = vsub.f32 %v392_v22, %v452_v29  ;;  %v465_v59 = vsub.f32 %v396_v23, %v452_v29  ;;  %v466_v60 = vsub.f32 %v400_v25, %v452_v29 }
  0xb7   : > { %v467_v61 = vsub.f32 %v404_v26, %v452_v29  ;;  %v468_v62 = vsub.f32 %v408_v27, %v452_v29  ;;  %v469_v63 = vsub.f32 %v412_v28, %v452_v29  ;;  %v470_v0 = vsub.f32 %v416_v30, %v452_v29 }
  0xb8   : > { %v457_v55 = vpop.permute.xlu1 %456  ;;  %v471_v1 = vsub.f32 %v420_v31, %v452_v29  ;;  %v472_v2 = vsub.f32 %v424_v32, %v452_v29  ;;  %v473_v3 = vsub.f32 %v428_v33, %v452_v29  ;;  %v474_v4 = vsub.f32 %v432_v35, %v452_v29 }
  0xb9   : > { %v475_v5 = vsub.f32 %v372_v17, %v457_v55  ;;  %v476_v6 = vsub.f32 %v376_v18, %v457_v55  ;;  %v477_v7 = vsub.f32 %v380_v19, %v457_v55  ;;  %v478_v8 = vsub.f32 %v384_v20, %v457_v55 }
  0xba   : > { %v479_v9 = vsub.f32 %v388_v21, %v457_v55  ;;  %v480_v10 = vsub.f32 %v392_v22, %v457_v55  ;;  %v481_v11 = vsub.f32 %v396_v23, %v457_v55  ;;  %v482_v12 = vsub.f32 %v400_v25, %v457_v55 }
  0xbb   : > { %v483_v13 = vsub.f32 %v404_v26, %v457_v55  ;;  %v484_v14 = vsub.f32 %v408_v27, %v457_v55  ;;  %v485_v15 = vsub.f32 %v412_v28, %v457_v55  ;;  %v486_v16 = vsub.f32 %v416_v30, %v457_v55  ;;  %v324_v27 = vpop.permute.xlu0 %323 }
  0xbc   : > { %v487_v24 = vsub.f32 %v420_v31, %v457_v55  ;;  %v488_v34 = vsub.f32 %v424_v32, %v457_v55  ;;  %v489_v54 = vsub.f32 %v428_v33, %v457_v55  ;;  %v490_v50 = vsub.f32 %v432_v35, %v457_v55 }
  0xbd   : > { %v1291_v49 = vmul.f32 %v459_v51, %v459_v51  ;;  %v1293_v48 = vmul.f32 %v460_v52, %v460_v52  ;;  %v1295_v17 = vmul.f32 %v461_v53, %v461_v53  ;;  %v1297_v18 = vmul.f32 %v462_v56, %v462_v56 }
  0xbe   : > { %v1299_v19 = vmul.f32 %v463_v57, %v463_v57  ;;  %v1301_v20 = vmul.f32 %v464_v58, %v464_v58  ;;  %v1303_v21 = vmul.f32 %v465_v59, %v465_v59  ;;  %v1305_v22 = vmul.f32 %v466_v60, %v466_v60 }
  0xbf   : > { %v1307_v23 = vmul.f32 %v467_v61, %v467_v61  ;;  %v1309_v25 = vmul.f32 %v468_v62, %v468_v62  ;;  %v1311_v26 = vmul.f32 %v469_v63, %v469_v63  ;;  %v1313_v28 = vmul.f32 %v470_v0, %v470_v0 }
  0xc0   : > { %v1315_v29 = vmul.f32 %v471_v1, %v471_v1  ;;  %v1317_v30 = vmul.f32 %v472_v2, %v472_v2  ;;  %v1319_v31 = vmul.f32 %v473_v3, %v473_v3  ;;  %v1321_v32 = vmul.f32 %v474_v4, %v474_v4 }
  0xc1   : > { %1771 = vst [vmem:[#allocation12_spill] sm:$0xff] %v1313_v28  ;;  %v1323_v33 = vmul.f32 %v475_v5, %v475_v5  ;;  %v1325_v35 = vmul.f32 %v476_v6, %v476_v6  ;;  %v1327_v51 = vmul.f32 %v477_v7, %v477_v7  ;;  %v1329_v52 = vmul.f32 %v478_v8, %v478_v8  ;;  %v329_v5 = vpop.permute.xlu0 %328 }
  0xc2   : > { %1772 = vst [vmem:[#allocation13_spill] sm:$0xff] %v1315_v29  ;;  %1773 = vst [vmem:[#allocation14_spill] sm:$0xff] %v1317_v30  ;;  %v1331_v53 = vmul.f32 %v479_v9, %v479_v9  ;;  %v1333_v55 = vmul.f32 %v480_v10, %v480_v10  ;;  %v1335_v56 = vmul.f32 %v481_v11, %v481_v11 }
  0xc3   : > { %1774 = vst [vmem:[#allocation15_spill] sm:$0xff] %v1319_v31  ;;  %1775 = vst [vmem:[#allocation16_spill] sm:$0xff] %v1321_v32  ;;  %v1337_v57 = vmul.f32 %v482_v12, %v482_v12  ;;  %v1339_v58 = vmul.f32 %v483_v13, %v483_v13  ;;  %v1341_v59 = vmul.f32 %v484_v14, %v484_v14  ;;  %v1792_v13 = vld [vmem:[#allocation8_spill] sm:$0xff] }
  0xc4   : > { %1776 = vst [vmem:[#allocation17_spill] sm:$0xff] %v1323_v33  ;;  %1777 = vst [vmem:[#allocation18_spill] sm:$0xff] %v1325_v35  ;;  %v1343_v60 = vmul.f32 %v485_v15, %v485_v15  ;;  %v1345_v61 = vmul.f32 %v486_v16, %v486_v16  ;;  %v1347_v62 = vmul.f32 %v487_v24, %v487_v24  ;;  %v1793_v15 = vld [vmem:[#allocation9_spill] sm:$0xff]  ;;  %v1794_v24 = vld [vmem:[#allocation10_spill] sm:$0xff] }
  0xc5   : > { %1778 = vst [vmem:[#allocation19_spill] sm:$0xff] %v1327_v51  ;;  %1779 = vst [vmem:[#allocation20_spill] sm:$0xff] %v1329_v52  ;;  %v1349_v63 = vmul.f32 %v488_v34, %v488_v34  ;;  %v1351_v0 = vmul.f32 %v489_v54, %v489_v54  ;;  %v1353_v1 = vmul.f32 %v490_v50, %v490_v50 }
  0xc6   : > { %1780 = vst [vmem:[#allocation21_spill] sm:$0xff] %v1331_v53  ;;  %1781 = vst [vmem:[#allocation22_spill] sm:$0xff] %v1333_v55  ;;  %v331_v2 = vsub.f32 %v1259_v36, %v324_v27  ;;  %v332_v3 = vsub.f32 %v1261_v37, %v324_v27  ;;  %v333_v4 = vsub.f32 %v1263_v38, %v324_v27 }
  0xc7   : > { %1782 = vst [vmem:[#allocation23_spill] sm:$0xff] %v1335_v56  ;;  %1783 = vst [vmem:[#allocation24_spill] sm:$0xff] %v1337_v57  ;;  %v334_v6 = vsub.f32 %v1265_v39, %v324_v27  ;;  %v335_v7 = vsub.f32 %v1267_v40, %v324_v27  ;;  %v336_v8 = vsub.f32 %v1269_v41, %v324_v27 }
  0xc8   : > { %1784 = vst [vmem:[#allocation25_spill] sm:$0xff] %v1339_v58  ;;  %1785 = vst [vmem:[#allocation26_spill] sm:$0xff] %v1341_v59  ;;  %v337_v9 = vsub.f32 %v1271_v42, %v324_v27  ;;  %v338_v54 = vsub.f32 %v1273_v43, %v324_v27  ;;  %v339_v50 = vsub.f32 %v1275_v44, %v324_v27 }
  0xc9   : > { %1786 = vst [vmem:[#allocation27_spill] sm:$0xff] %v1343_v60  ;;  %1787 = vst [vmem:[#allocation28_spill] sm:$0xff] %v1345_v61  ;;  %v340_v10 = vsub.f32 %v1277_v45, %v324_v27  ;;  %v341_v11 = vsub.f32 %v1279_v46, %v324_v27  ;;  %v342_v12 = vsub.f32 %v1281_v47, %v324_v27 }
  0xca   : > { %1788 = vst [vmem:[#allocation29_spill] sm:$0xff] %v1347_v62  ;;  %1789 = vst [vmem:[#allocation30_spill] sm:$0xff] %v1349_v63  ;;  %v343_v14 = vsub.f32 %v1792_v13, %v324_v27  ;;  %v344_v16 = vsub.f32 %v1793_v15, %v324_v27  ;;  %v345_v34 = vsub.f32 %v1794_v24, %v324_v27 }
  0xcb   : > { %1790 = vst [vmem:[#allocation31_spill] sm:$0xff] %v1351_v0  ;;  %1791 = vst [vmem:[#allocation32_spill] sm:$0xff] %v1353_v1  ;;  %v1795_v1 = vld [vmem:[#allocation11_spill] sm:$0xff]  ;;  %v347_v63 = vsub.f32 %v1259_v36, %v329_v5  ;;  %v348_v62 = vsub.f32 %v1261_v37, %v329_v5  ;;  %v349_v61 = vsub.f32 %v1263_v38, %v329_v5 }
  0xcc   : > { %v346_v0 = vsub.f32 %v1795_v1, %v324_v27  ;;  %v350_v60 = vsub.f32 %v1265_v39, %v329_v5  ;;  %v351_v59 = vsub.f32 %v1267_v40, %v329_v5  ;;  %v352_v58 = vsub.f32 %v1269_v41, %v329_v5 }
  0xcd   : > { %v353_v57 = vsub.f32 %v1271_v42, %v329_v5  ;;  %v354_v56 = vsub.f32 %v1273_v43, %v329_v5  ;;  %v355_v55 = vsub.f32 %v1275_v44, %v329_v5  ;;  %v356_v27 = vsub.f32 %v1277_v45, %v329_v5 }
  0xce   : > { %v357_v36 = vsub.f32 %v1279_v46, %v329_v5  ;;  %v358_v37 = vsub.f32 %v1281_v47, %v329_v5  ;;  %v359_v38 = vsub.f32 %v1792_v13, %v329_v5  ;;  %v360_v39 = vsub.f32 %v1793_v15, %v329_v5 }
  0xcf   : > { %v361_v40 = vsub.f32 %v1794_v24, %v329_v5  ;;  %v362_v41 = vsub.f32 %v1795_v1, %v329_v5  ;;  %v491_v53 = vmul.f32 %v331_v2, %v331_v2  ;;  %v492_v42 = vmul.f32 %v332_v3, %v332_v3 }
  0xd0   : > { %v493_v52 = vmul.f32 %v333_v4, %v333_v4  ;;  %v494_v43 = vmul.f32 %v334_v6, %v334_v6  ;;  %v495_v51 = vmul.f32 %v335_v7, %v335_v7  ;;  %v496_v44 = vmul.f32 %v336_v8, %v336_v8 }
  0xd1   : > { %v497_v35 = vmul.f32 %v337_v9, %v337_v9  ;;  %v498_v45 = vmul.f32 %v338_v54, %v338_v54  ;;  %v499_v33 = vmul.f32 %v339_v50, %v339_v50  ;;  %v500_v46 = vmul.f32 %v340_v10, %v340_v10 }
  0xd2   : > { %v501_v32 = vmul.f32 %v341_v11, %v341_v11  ;;  %v502_v47 = vmul.f32 %v342_v12, %v342_v12  ;;  %v503_v31 = vmul.f32 %v343_v14, %v343_v14  ;;  %v504_v13 = vmul.f32 %v344_v16, %v344_v16  ;;  %v1805_v14 = vld [vmem:[#allocation21_spill] sm:$0xff]  ;;  %v1806_v16 = vld [vmem:[#allocation22_spill] sm:$0xff] }
  0xd3   : > { %v505_v30 = vmul.f32 %v345_v34, %v345_v34  ;;  %v506_v15 = vmul.f32 %v346_v0, %v346_v0  ;;  %v507_v29 = vmul.f32 %v347_v63, %v347_v63  ;;  %v508_v24 = vmul.f32 %v348_v62, %v348_v62  ;;  %v1797_v63 = vld [vmem:[#allocation13_spill] sm:$0xff] }
  0xd4   : > { %v509_v28 = vmul.f32 %v349_v61, %v349_v61  ;;  %v510_v1 = vmul.f32 %v350_v60, %v350_v60  ;;  %v511_v2 = vmul.f32 %v351_v59, %v351_v59  ;;  %v512_v3 = vmul.f32 %v352_v58, %v352_v58  ;;  %v1796_v61 = vld [vmem:[#allocation12_spill] sm:$0xff] }
  0xd5   : > { %v513_v4 = vmul.f32 %v353_v57, %v353_v57  ;;  %v514_v5 = vmul.f32 %v354_v56, %v354_v56  ;;  %v515_v6 = vmul.f32 %v355_v55, %v355_v55  ;;  %v516_v7 = vmul.f32 %v356_v27, %v356_v27  ;;  %v1807_v27 = vld [vmem:[#allocation23_spill] sm:$0xff] }
  0xd6   : > { %v517_v8 = vmul.f32 %v357_v36, %v357_v36  ;;  %v518_v9 = vmul.f32 %v358_v37, %v358_v37  ;;  %v519_v54 = vmul.f32 %v359_v38, %v359_v38  ;;  %v520_v50 = vmul.f32 %v360_v39, %v360_v39  ;;  %v1808_v37 = vld [vmem:[#allocation24_spill] sm:$0xff]  ;;  %v1809_v39 = vld [vmem:[#allocation25_spill] sm:$0xff] }
  0xd7   : > { %v555_v10 = vadd.f32 %v1291_v49, %v491_v53  ;;  %v521_v11 = vmul.f32 %v361_v40, %v361_v40  ;;  %v522_v12 = vmul.f32 %v362_v41, %v362_v41  ;;  %v556_v0 = vadd.f32 %v1293_v48, %v492_v42  ;;  %v1810_v41 = vld [vmem:[#allocation26_spill] sm:$0xff] }
  0xd8   : > { %v557_v62 = vadd.f32 %v1295_v17, %v493_v52  ;;  %v558_v60 = vadd.f32 %v1297_v18, %v494_v43  ;;  %v559_v58 = vadd.f32 %v1299_v19, %v495_v51  ;;  %v560_v56 = vadd.f32 %v1301_v20, %v496_v44  ;;  %v1798_v52 = vld [vmem:[#allocation14_spill] sm:$0xff]  ;;  %v1799_v19 = vld [vmem:[#allocation15_spill] sm:$0xff] }
  0xd9   : > { %v561_v55 = vadd.f32 %v1303_v21, %v497_v35  ;;  %v562_v57 = vadd.f32 %v1305_v22, %v498_v45  ;;  %v563_v59 = vadd.f32 %v1307_v23, %v499_v33  ;;  %v564_v49 = vadd.f32 %v1309_v25, %v500_v46  ;;  %v1800_v21 = vld [vmem:[#allocation16_spill] sm:$0xff]  ;;  %v1801_v22 = vld [vmem:[#allocation17_spill] sm:$0xff]  ;;  %v1802_v25 = vld [vmem:[#allocation18_spill] sm:$0xff] }
  0xda   : > { %v565_v53 = vadd.f32 %v1311_v26, %v501_v32  ;;  %v566_v48 = vadd.f32 %v1796_v61, %v502_v47  ;;  %v567_v17 = vadd.f32 %v1797_v63, %v503_v31  ;;  %v1401_v18 = vadd.f32 %v1798_v52, %v504_v13  ;;  %v1803_v32 = vld [vmem:[#allocation19_spill] sm:$0xff]  ;;  %v1804_v31 = vld [vmem:[#allocation20_spill] sm:$0xff] }
  0xdb   : > { %vm587_vm0 = vcmp.eq.f32.partialorder %v555_v10, 0.0  ;;  %v1404_v20 = vadd.f32 %v1799_v19, %v505_v30  ;;  %v1407_v35 = vadd.f32 %v1800_v21, %v506_v15  ;;  %v1410_v23 = vadd.f32 %v1801_v22, %v507_v29  ;;  %v1811_v44 = vld [vmem:[#allocation27_spill] sm:$0xff]  ;;  %v1812_v47 = vld [vmem:[#allocation28_spill] sm:$0xff] }
  0xdc   : > { %vm588_vm1 = vcmp.eq.f32.partialorder %v556_v0, 0.0  ;;  %v1413_v26 = vadd.f32 %v1802_v25, %v508_v24  ;;  %v1416_v33 = vadd.f32 %v1803_v32, %v509_v28  ;;  %v1419_v51 = vadd.f32 %v1804_v31, %v510_v1  ;;  %v1813_v24 = vld [vmem:[#allocation29_spill] sm:$0xff] }
  0xdd   : > { %vm589_vm2 = vcmp.eq.f32.partialorder %v557_v62, 0.0  ;;  %v1422_v30 = vadd.f32 %v1805_v14, %v511_v2  ;;  %v1425_v34 = vadd.f32 %v1806_v16, %v512_v3  ;;  %vm590_vm3 = vcmp.eq.f32.partialorder %v558_v60, 0.0  ;;  %v1814_v3 = vld [vmem:[#allocation30_spill] sm:$0xff] }
  0xde   : > { %v1427_v29 = vsel %vm587_vm0, 1.0, %v555_v10  ;;  %v1430_v36 = vadd.f32 %v1807_v27, %v513_v4  ;;  %v1433_v38 = vadd.f32 %v1808_v37, %v514_v5  ;;  %vm591_vm4 = vcmp.eq.f32.partialorder %v559_v58, 0.0 }
  0xdf   : > { %v1435_v28 = vsel %vm588_vm1, 1.0, %v556_v0  ;;  %v1438_v40 = vadd.f32 %v1809_v39, %v515_v6  ;;  %v1441_v42 = vadd.f32 %v1810_v41, %v516_v7  ;;  %vm592_vm5 = vcmp.eq.f32.partialorder %v560_v56, 0.0  ;;  %v1815_v6 = vld [vmem:[#allocation31_spill] sm:$0xff] }
  0xe0   : > { %v1443_v43 = vsel %vm589_vm2, 1.0, %v557_v62  ;;  %v1446_v45 = vadd.f32 %v1811_v44, %v517_v8  ;;  %vm593_vm6 = vcmp.eq.f32.partialorder %v561_v55, 0.0  ;;  %v1448_v46 = vsel %vm590_vm3, 1.0, %v558_v60 }
  0xe1   : > { %944 = vlog2.f32 %v1427_v29  ;;  %v1452_v13 = vadd.f32 %v1812_v47, %v518_v9  ;;  %vm594_vm7 = vcmp.eq.f32.partialorder %v562_v57, 0.0  ;;  %v1454_v15 = vsel %vm591_vm4, 1.0, %v559_v58  ;;  %v1816_v9 = vld [vmem:[#allocation32_spill] sm:$0xff] }
  0xe2   : > { %946 = vlog2.f32 %v1435_v28  ;;  %v1458_v1 = vadd.f32 %v1813_v24, %v519_v54  ;;  %vm595_vm8 = vcmp.eq.f32.partialorder %v563_v59, 0.0  ;;  %v1460_v2 = vsel %vm592_vm5, 1.0, %v560_v56 }
  0xe3   : > { %948 = vlog2.f32 %v1443_v43  ;;  %v1464_v4 = vadd.f32 %v1814_v3, %v520_v50  ;;  %vm596_vm9 = vcmp.eq.f32.partialorder %v564_v49, 0.0  ;;  %v1466_v5 = vsel %vm593_vm6, 1.0, %v561_v55 }
  0xe4   : > { %950 = vlog2.f32 %v1448_v46  ;;  %v1470_v7 = vadd.f32 %v1815_v6, %v521_v11  ;;  %vm597_vm10 = vcmp.eq.f32.partialorder %v565_v53, 0.0  ;;  %v1472_v8 = vsel %vm594_vm7, 1.0, %v562_v57 }
  0xe5   : > { %952 = vlog2.f32 %v1454_v15  ;;  %v1476_v54 = vadd.f32 %v1816_v9, %v522_v12  ;;  %vm598_vm11 = vcmp.eq.f32.partialorder %v566_v48, 0.0  ;;  %v1478_v10 = vsel %vm595_vm8, 1.0, %v563_v59 }
  0xe6   : > { %954 = vlog2.f32 %v1460_v2  ;;  %vm599_vm12 = vcmp.eq.f32.partialorder %v567_v17, 0.0  ;;  %vm600_vm13 = vcmp.eq.f32.partialorder %v1401_v18, 0.0  ;;  %v1482_v50 = vsel %vm596_vm9, 1.0, %v564_v49 }
  0xe7   : > { %956 = vlog2.f32 %v1466_v5  ;;  %vm601_vm14 = vcmp.eq.f32.partialorder %v1404_v20, 0.0  ;;  %vm602_vm15 = vcmp.eq.f32.partialorder %v1407_v35, 0.0  ;;  %v1487_v11 = vsel %vm597_vm10, 1.0, %v565_v53 }
  0xe8   : > { %958 = vlog2.f32 %v1472_v8  ;;  %vm603_vm0 = vcmp.eq.f32.partialorder %v1410_v23, 0.0  ;;  %vm604_vm1 = vcmp.eq.f32.partialorder %v1413_v26, 0.0  ;;  %v1492_v12 = vsel %vm598_vm11, 1.0, %v566_v48 }
  0xe9   : > { %960 = vlog2.f32 %v1478_v10  ;;  %vm605_vm2 = vcmp.eq.f32.partialorder %v1416_v33, 0.0  ;;  %vm606_vm3 = vcmp.eq.f32.partialorder %v1419_v51, 0.0  ;;  %v1497_v0 = vsel %vm599_vm12, 1.0, %v567_v17 }
  0xea   : > { %962 = vlog2.f32 %v1482_v50  ;;  %vm607_vm4 = vcmp.eq.f32.partialorder %v1422_v30, 0.0  ;;  %vm608_vm5 = vcmp.eq.f32.partialorder %v1425_v34, 0.0  ;;  %v1505_v62 = vsel %vm600_vm13, 1.0, %v1401_v18 }
  0xeb   : > { %964 = vlog2.f32 %v1487_v11  ;;  %vm609_vm6 = vcmp.eq.f32.partialorder %v1430_v36, 0.0  ;;  %vm610_vm7 = vcmp.eq.f32.partialorder %v1433_v38, 0.0  ;;  %v1513_v60 = vsel %vm601_vm14, 1.0, %v1404_v20 }
  0xec   : > { %966 = vlog2.f32 %v1492_v12  ;;  %vm611_vm8 = vcmp.eq.f32.partialorder %v1438_v40, 0.0  ;;  %vm612_vm9 = vcmp.eq.f32.partialorder %v1441_v42, 0.0  ;;  %v1522_v58 = vsel %vm602_vm15, 1.0, %v1407_v35 }
  0xed   : > { %968 = vlog2.f32 %v1497_v0  ;;  %vm613_vm10 = vcmp.eq.f32.partialorder %v1446_v45, 0.0  ;;  %vm614_vm11 = vcmp.eq.f32.partialorder %v1452_v13, 0.0  ;;  %v1530_v55 = vsel %vm603_vm0, 1.0, %v1410_v23 }
  0xee   : > { %v945_v56 = vpop.eup %944  ;;  %970 = vlog2.f32 %v1505_v62  ;;  %vm615_vm12 = vcmp.eq.f32.partialorder %v1458_v1, 0.0  ;;  %v1537_v59 = vsel %vm604_vm1, 1.0, %v1413_v26  ;;  %vm616_vm13 = vcmp.eq.f32.partialorder %v1464_v4, 0.0 }
  0xef   : > { %v947_v57 = vpop.eup %946  ;;  %v652_v49 = vmul.f32 0.6931472, %v945_v56  ;;  %972 = vlog2.f32 %v1513_v60  ;;  %v1544_v61 = vsel %vm605_vm2, 1.0, %v1416_v33  ;;  %vm617_vm14 = vcmp.eq.f32.partialorder %v1470_v7, 0.0 }
  0xf0   : > { %v949_v53 = vpop.eup %948  ;;  %v654_v48 = vmul.f32 0.6931472, %v947_v57  ;;  %974 = vlog2.f32 %v1522_v58  ;;  %v1551_v17 = vsel %vm606_vm3, 1.0, %v1419_v51  ;;  %vm618_vm15 = vcmp.eq.f32.partialorder %v1476_v54, 0.0 }
  0xf1   : > { %v951_v63 = vpop.eup %950  ;;  %v656_v52 = vmul.f32 0.6931472, %v949_v53  ;;  %976 = vlog2.f32 %v1530_v55  ;;  %v715_v18 = vmul.f32 %v652_v49, %v1427_v29  ;;  %v1559_v20 = vsel %vm607_vm4, 1.0, %v1422_v30 }
  0xf2   : > { %v953_v19 = vpop.eup %952  ;;  %v658_v21 = vmul.f32 0.6931472, %v951_v63  ;;  %978 = vlog2.f32 %v1537_v59  ;;  %v716_v35 = vmul.f32 %v654_v48, %v1435_v28  ;;  %v1566_v23 = vsel %vm608_vm5, 1.0, %v1425_v34 }
  0xf3   : > { %v955_v22 = vpop.eup %954  ;;  %v660_v25 = vmul.f32 0.6931472, %v953_v19  ;;  %980 = vlog2.f32 %v1544_v61  ;;  %v717_v26 = vmul.f32 %v656_v52, %v1443_v43  ;;  %747 = vst [vmem:[%s1572_s9] sm:$0xff] %v715_v18  ;;  %v1578_v33 = vsel %vm609_vm6, 1.0, %v1430_v36 }
  0xf4   : > { %v957_v32 = vpop.eup %956  ;;  %v662_v31 = vmul.f32 0.6931472, %v955_v22  ;;  %982 = vlog2.f32 %v1551_v17  ;;  %v718_v51 = vmul.f32 %v658_v21, %v1448_v46  ;;  %748 = vst [vmem:[%s1572_s9 + $0x8] sm:$0xff] %v716_v35  ;;  %v1586_v30 = vsel %vm610_vm7, 1.0, %v1433_v38 }
  0xf5   : > { %v959_v14 = vpop.eup %958  ;;  %v664_v16 = vmul.f32 0.6931472, %v957_v32  ;;  %984 = vlog2.f32 %v1559_v20  ;;  %v719_v34 = vmul.f32 %v660_v25, %v1454_v15  ;;  %749 = vst [vmem:[%s1572_s9 + $0x10] sm:$0xff] %v717_v26  ;;  %v1594_v27 = vsel %vm611_vm8, 1.0, %v1438_v40 }
  0xf6   : > { %v961_v29 = vpop.eup %960  ;;  %v666_v36 = vmul.f32 0.6931472, %v959_v14  ;;  %986 = vlog2.f32 %v1566_v23  ;;  %v720_v37 = vmul.f32 %v662_v31, %v1460_v2  ;;  %750 = vst [vmem:[%s1572_s9 + $0x18] sm:$0xff] %v718_v51  ;;  %v1602_v28 = vsel %vm612_vm9, 1.0, %v1441_v42 }
  0xf7   : > { %v963_v38 = vpop.eup %962  ;;  %v668_v39 = vmul.f32 0.6931472, %v961_v29  ;;  %988 = vlog2.f32 %v1578_v33  ;;  %v721_v40 = vmul.f32 %v664_v16, %v1466_v5  ;;  %751 = vst [vmem:[%s1572_s9 + $0x20] sm:$0xff] %v719_v34  ;;  %v1610_v43 = vsel %vm613_vm10, 1.0, %v1446_v45 }
  0xf8   : > { %v965_v41 = vpop.eup %964  ;;  %v670_v44 = vmul.f32 0.6931472, %v963_v38  ;;  %990 = vlog2.f32 %v1586_v30  ;;  %v722_v42 = vmul.f32 %v666_v36, %v1472_v8  ;;  %752 = vst [vmem:[%s1572_s9 + $0x28] sm:$0xff] %v720_v37  ;;  %v1618_v47 = vsel %vm614_vm11, 1.0, %v1452_v13 }
  0xf9   : > { %v967_v46 = vpop.eup %966  ;;  %v672_v15 = vmul.f32 0.6931472, %v965_v41  ;;  %992 = vlog2.f32 %v1594_v27  ;;  %v723_v45 = vmul.f32 %v668_v39, %v1478_v10  ;;  %753 = vst [vmem:[%s1572_s9 + $0x30] sm:$0xff] %v721_v40  ;;  %v1626_v2 = vsel %vm615_vm12, 1.0, %v1458_v1 }
  0xfa   : > { %v969_v24 = vpop.eup %968  ;;  %v674_v3 = vmul.f32 0.6931472, %v967_v46  ;;  %994 = vlog2.f32 %v1602_v28  ;;  %v724_v13 = vmul.f32 %v670_v44, %v1482_v50  ;;  %754 = vst [vmem:[%s1572_s9 + $0x38] sm:$0xff] %v722_v42  ;;  %v1634_v6 = vsel %vm616_vm13, 1.0, %v1464_v4 }
  0xfb   : > { %v971_v5 = vpop.eup %970  ;;  %v676_v8 = vmul.f32 0.6931472, %v969_v24  ;;  %996 = vlog2.f32 %v1610_v43  ;;  %v725_v1 = vmul.f32 %v672_v15, %v1487_v11  ;;  %755 = vst [vmem:[%s1572_s9 + $0x40] sm:$0xff] %v723_v45  ;;  %v1642_v10 = vsel %vm617_vm14, 1.0, %v1470_v7 }
  0xfc   : > { %v973_v9 = vpop.eup %972  ;;  %v678_v50 = vmul.f32 0.6931472, %v971_v5  ;;  %998 = vlog2.f32 %v1618_v47  ;;  %v726_v4 = vmul.f32 %v674_v3, %v1492_v12  ;;  %756 = vst [vmem:[%s1572_s9 + $0x48] sm:$0xff] %v724_v13  ;;  %v1650_v11 = vsel %vm618_vm15, 1.0, %v1476_v54 }
  0xfd   : > { %v975_v56 = vpop.eup %974  ;;  %v680_v57 = vmul.f32 0.6931472, %v973_v9  ;;  %1000 = vlog2.f32 %v1626_v2  ;;  %v727_v49 = vmul.f32 %v676_v8, %v1497_v0  ;;  %757 = vst [vmem:[%s1572_s9 + $0x50] sm:$0xff] %v725_v1 }
  0xfe   : > { %v977_v7 = vpop.eup %976  ;;  %v682_v53 = vmul.f32 0.6931472, %v975_v56  ;;  %1002 = vlog2.f32 %v1634_v6  ;;  %v728_v12 = vmul.f32 %v678_v50, %v1505_v62  ;;  %758 = vst [vmem:[%s1572_s9 + $0x58] sm:$0xff] %v726_v4 }
  0xff   : > { %v979_v48 = vpop.eup %978  ;;  %v684_v63 = vmul.f32 0.6931472, %v977_v7  ;;  %1004 = vlog2.f32 %v1642_v10  ;;  %v729_v54 = vmul.f32 %v680_v57, %v1513_v60  ;;  %759 = vst [vmem:[%s1572_s9 + $0x60] sm:$0xff] %v727_v49 }
 0x100   : > { %v981_v52 = vpop.eup %980  ;;  %v686_v0 = vmul.f32 0.6931472, %v979_v48  ;;  %1006 = vlog2.f32 %v1650_v11  ;;  %v730_v18 = vmul.f32 %v682_v53, %v1522_v58  ;;  %760 = vst [vmem:[%s1572_s9 + $0x68] sm:$0xff] %v728_v12 }
 0x101   : > { %v983_v19 = vpop.eup %982  ;;  %v688_v62 = vmul.f32 0.6931472, %v981_v52  ;;  %v731_v21 = vmul.f32 %v684_v63, %v1530_v55  ;;  %761 = vst [vmem:[%s1572_s9 + $0x70] sm:$0xff] %v729_v54 }
 0x102   : > { %v985_v35 = vpop.eup %984  ;;  %v690_v22 = vmul.f32 0.6931472, %v983_v19  ;;  %v732_v60 = vmul.f32 %v686_v0, %v1537_v59  ;;  %762 = vst [vmem:[%s1572_s9 + $0x78] sm:$0xff] %v730_v18 }
 0x103   : > { %v987_v25 = vpop.eup %986  ;;  %v692_v26 = vmul.f32 0.6931472, %v985_v35  ;;  %v733_v32 = vmul.f32 %v688_v62, %v1544_v61  ;;  %763 = vst [vmem:[%s1572_s9 + $0x80] sm:$0xff] %v731_v21 }
 0x104   : > { %v989_v58 = vpop.eup %988  ;;  %v694_v31 = vmul.f32 0.6931472, %v987_v25  ;;  %v734_v51 = vmul.f32 %v690_v22, %v1551_v17  ;;  %764 = vst [vmem:[%s1572_s9 + $0x88] sm:$0xff] %v732_v60 }
 0x105   : > { %v991_v55 = vpop.eup %990  ;;  %v696_v14 = vmul.f32 0.6931472, %v989_v58  ;;  %v735_v16 = vmul.f32 %v692_v26, %v1559_v20  ;;  %765 = vst [vmem:[%s1572_s9 + $0x90] sm:$0xff] %v733_v32 }
 0x106   : > { %v993_v59 = vpop.eup %992  ;;  %v698_v34 = vmul.f32 0.6931472, %v991_v55  ;;  %v736_v29 = vmul.f32 %v694_v31, %v1566_v23  ;;  %766 = vst [vmem:[%s1572_s9 + $0x98] sm:$0xff] %v734_v51 }
 0x107   : > { %v995_v61 = vpop.eup %994  ;;  %v700_v36 = vmul.f32 0.6931472, %v993_v59  ;;  %v737_v37 = vmul.f32 %v696_v14, %v1578_v33  ;;  %767 = vst [vmem:[%s1572_s9 + $0xa0] sm:$0xff] %v735_v16 }
 0x108   : > { %v997_v17 = vpop.eup %996  ;;  %v702_v38 = vmul.f32 0.6931472, %v995_v61  ;;  %v738_v39 = vmul.f32 %v698_v34, %v1586_v30  ;;  %768 = vst [vmem:[%s1572_s9 + $0xa8] sm:$0xff] %v736_v29 }
 0x109   : > { %v999_v20 = vpop.eup %998  ;;  %v704_v40 = vmul.f32 0.6931472, %v997_v17  ;;  %v739_v23 = vmul.f32 %v700_v36, %v1594_v27  ;;  %769 = vst [vmem:[%s1572_s9 + $0xb0] sm:$0xff] %v737_v37 }
 0x10a   : > { %v1001_v41 = vpop.eup %1000  ;;  %v706_v44 = vmul.f32 0.6931472, %v999_v20  ;;  %v740_v33 = vmul.f32 %v702_v38, %v1602_v28  ;;  %770 = vst [vmem:[%s1572_s9 + $0xb8] sm:$0xff] %v738_v39 }
 0x10b   : > { %v1003_v42 = vpop.eup %1002  ;;  %v708_v46 = vmul.f32 0.6931472, %v1001_v41  ;;  %v741_v15 = vmul.f32 %v704_v40, %v1610_v43  ;;  %771 = vst [vmem:[%s1572_s9 + $0xc0] sm:$0xff] %v739_v23 }
 0x10c   : > { %v1005_v30 = vpop.eup %1004  ;;  %v710_v45 = vmul.f32 0.6931472, %v1003_v42  ;;  %v742_v27 = vmul.f32 %v706_v44, %v1618_v47  ;;  %772 = vst [vmem:[%s1572_s9 + $0xc8] sm:$0xff] %v740_v33 }
 0x10d   : > { %v1007_v28 = vpop.eup %1006  ;;  %v712_v24 = vmul.f32 0.6931472, %v1005_v30  ;;  %v743_v3 = vmul.f32 %v708_v46, %v1626_v2  ;;  %773 = vst [vmem:[%s1572_s9 + $0xd0] sm:$0xff] %v741_v15 }
 0x10e   : > { %v714_v43 = vmul.f32 0.6931472, %v1007_v28  ;;  %v744_v13 = vmul.f32 %v710_v45, %v1634_v6  ;;  %774 = vst [vmem:[%s1572_s9 + $0xd8] sm:$0xff] %v742_v27 }
 0x10f   : > { %v745_v47 = vmul.f32 %v712_v24, %v1642_v10  ;;  %775 = vst [vmem:[%s1572_s9 + $0xe0] sm:$0xff] %v743_v3 }
 0x110   : > { %v746_v2 = vmul.f32 %v714_v43, %v1650_v11  ;;  %776 = vst [vmem:[%s1572_s9 + $0xe8] sm:$0xff] %v744_v13 }
 0x111   : > { %777 = vst [vmem:[%s1572_s9 + $0xf0] sm:$0xff] %v745_v47 }
 0x112   : > { %778 = vst [vmem:[%s1572_s9 + $0xf8] sm:$0xff] %v746_v2 }
 0x113   : > { %1049 = shalt.err (!%p1046_p2)
}
 0x114   : > { %s1050_s23 = scalar_lea.hbm %s1697_s10, 4096  ;;  %s1054_s30 = scalar_lea.hbm %s1752_s4, 8192 }
 0x115   : > { %p1051_p4 = scmp.ne.s32.totalorder %s1697_s10, %s1050_s23  ;;  %p1055_p0 = scmp.lt.s32.totalorder %s1697_s10, %s1752_s4 }
 0x116   : > { %p1056_p6 = scmp.lt.s32.totalorder %s1054_s30, %s1050_s23 }
 0x117   : > { %p1052_p9 = pnand %p1051_p4, %p1817_p13 }
 0x118   : > { %p1057_p11 = por %p1056_p6, %p1055_p0 }
 0x119   : > { %p1053_p7 = pneg %p1052_p9 }
 0x11b   : > { %p1058_p12 = pnand %p1057_p11, %p1053_p7 }
 0x11d   : > { %1061 = shalt.err (!%p1058_p12)
}
 0x11e   : > { %s1105_s9 = smov 2048   ;;  %s1106_s13 = smov 4096  }
 0x11f   : > { %s1107_s19 = smov 128  }
 0x120   : > { %894 = dma.vmem_to_hbm [thread:$0]  (%p1817_p13), %s1701_s14, 4096, %s1697_s10, %s780_s11, %s1105_s9, %s1106_s13, %s1107_s19  }
 0x121 PF: > { %s808_s8 = sand.u32 1, %s1088_s15   ;;  %p1818_p1 = scmp.ne.s32.totalorder %s1762_s28, 0 }
 0x122   : > { %p1819_p3 = scmp.ge.s32.totalorder %s1100_s18, 2  ;;  %s809_s12 = scalar_lea.sflag [#allocation4], %s808_s8 }
 0x124   : > { %p901_p5 = pnand %p1819_p3, %p1818_p1 }
 0x126   : > { %p902_p8 = pneg %p901_p5 }
 0x128   : > { %1083 = dma.done.wait (%p902_p8), %s809_s12, 4096  }
 0x129   : > { %1085 = vsyncadd (%p902_p8), %s809_s12, 4294963200  ;;  %p17_p10 = scmp.ge.s32.totalorder %s1158_s21, 4   ;;  %s1820_s15 = smov %s1092_s16 }
 0x12a   : > { %s1821_s16 = smov %s1096_s17  ;;  %s1822_s17 = smov %s1170_s24 }
 0x12b   : > { %s1823_s18 = smov %s1158_s21  ;;  %19 = sbr.rel (!%p17_p10) target bundleno = 5 (0x5), region = 84 }
 0x130   :  { %814 = vsyncpa [#allocation3], 1 }
 0x131   :  { %816 = vsyncpa [#allocation3 + $0x1], 1 }
 0x132   :  { %817 = vsyncpa [#allocation4], 1 }
 0x133   :  { %819 = vsyncpa [#allocation4 + $0x1], 1 }

</bundles_post_ra>
